<compile_context>
chip_gen: v5e
topology: v5e:2x2
jax: 0.10.0
libtpu: 0.0.40
codegen_flags: <defaults>
</compile_context>

<pallas_src>
import functools
import math

import jax
import jax.numpy as jnp
from jax.experimental import pallas as pl
from jax.experimental.pallas import tpu as pltpu


def _round_up(a, b):
    return -(-a // b) * b


def _row_sum_kernel(x_ref, out_ref, *, lane_chunks):
    """Accumulate per-lane partial row-sums of x into the resident out block."""
    j = pl.program_id(1)  # vocab (reduction) grid axis

    @pl.when(j == 0)
    def _():
        out_ref[...] = jnp.zeros_like(out_ref)

    acc = out_ref[...]
    if lane_chunks is None:
        # Fallback (vocab not a multiple of 128): whole-row reduce per tile.
        acc = acc + jnp.sum(x_ref[...].astype(jnp.float32), axis=-1,
                            keepdims=True)
    else:
        # Fast path: add 128-lane chunks into the (tn, 128) per-lane partials.
        # Static slices -> aligned vreg loads; upcast per chunk so no full-tile
        # f32 temporary is materialized.
        for t in range(lane_chunks):
            acc = acc + x_ref[:, t * 128:(t + 1) * 128].astype(jnp.float32)
    out_ref[...] = acc


def label_smoothing_kl_loss(x, target, *, size, padding_idx, smoothing=0.0,
                            batch_multiplier=1.0, tile_n=256, tile_v=2048):
    """x: (N, size) log-probs (float dtype), target: (N,) ints -> scalar loss."""
    n, v = x.shape
    assert v == size

    confidence = 1.0 - smoothing
    smooth_val = smoothing / (size - 1)
    # Host constant: sum_k td*log(td) for one valid row (0*log0 := 0).
    row_const = 0.0
    if smooth_val > 0.0:
        row_const += (size - 2) * smooth_val * math.log(smooth_val)
    if confidence > 0.0:
        row_const += confidence * math.log(confidence)

    itemsize = jnp.dtype(x.dtype).itemsize
    sub = max(8, 32 // max(1, itemsize))  # sublane tile: 8 f32 / 16 bf16 / 32 i8

    # Token tile: multiple of the sublane tile (or the full dim), and no larger
    # than ~N/2 so the "parallel" token axis splits across v7x's 2 TensorCores.
    if n <= sub:
        tn = n
    else:
        tn = min(_round_up(min(tile_n, n), sub), _round_up(-(-n // 2), sub))
        tn = max(tn, sub)

    # Vocab tile: a multiple of 128 that divides V exactly (no remainder tiles).
    if v % 128 == 0:
        tv = max(128, (min(tile_v, v) // 128) * 128)
        while v % tv != 0:
            tv -= 128
        lane_chunks = tv // 128
        out_lanes = 128
    else:
        tv = v            # single full-row tile; in-kernel masked lane reduce
        lane_chunks = None
        out_lanes = 1

    grid = (pl.cdiv(n, tn), pl.cdiv(v, tv))
    kernel = functools.partial(_row_sum_kernel, lane_chunks=lane_chunks)

    # VMEM budget derived from the actual double-buffered tile footprint
    # (keeps headroom on v7x's 64 MiB/TC, uses more only if tiles demand it).
    x_block_bytes = tn * tv * itemsize
    out_block_bytes = tn * out_lanes * 4
    vmem_limit = min(128 * 1024 * 1024,
                     max(16 * 1024 * 1024,
                         2 * (x_block_bytes + out_block_bytes) + (4 << 20)))

    cost = pl.CostEstimate(flops=n * v, transcendentals=0,
                           bytes_accessed=int(n * v * itemsize
                                              + n * out_lanes * 4))

    partials = pl.pallas_call(
        kernel,
        out_shape=jax.ShapeDtypeStruct((n, out_lanes), jnp.float32),
        grid=grid,
        in_specs=[pl.BlockSpec((tn, tv), lambda i, j: (i, j))],
        out_specs=pl.BlockSpec((tn, out_lanes), lambda i, j: (i, 0)),
        compiler_params=pltpu.CompilerParams(
            dimension_semantics=("parallel", "arbitrary"),
            vmem_limit_bytes=vmem_limit),
        cost_estimate=cost,
    )(x)

    # O(N) epilogue in XLA: cross-lane reduce, gathers, row masking, combine.
    row_sums = jnp.sum(partials, axis=-1)                                # (N,)
    tgt = target.astype(jnp.int32)
    x_tgt = jnp.take_along_axis(x, tgt[:, None], axis=1)[:, 0].astype(jnp.float32)
    x_pad = x[:, padding_idx].astype(jnp.float32)
    valid = tgt != padding_idx

    per_row = (jnp.float32(row_const)
               - jnp.float32(confidence - smooth_val) * x_tgt
               - jnp.float32(smooth_val) * (row_sums - x_pad))
    loss = jnp.sum(jnp.where(valid, per_row, jnp.float32(0.0)))
    return loss / jnp.float32(batch_multiplier)


def _reference(x, target, *, size, padding_idx, smoothing, batch_multiplier):
    n, v = x.shape
    confidence = 1.0 - smoothing
    smooth_val = smoothing / (size - 1)
    col = jnp.arange(v)[None, :]
    tgt = target[:, None]
    td = jnp.where(col == tgt, confidence, smooth_val).astype(jnp.float32)
    td = jnp.where(col == padding_idx, 0.0, td)
    td = jnp.where(tgt == padding_idx, 0.0, td)
    safe = jnp.where(td > 0, td, 1.0)
    elem = jnp.where(td > 0, td * (jnp.log(safe) - x.astype(jnp.float32)), 0.0)
    return jnp.sum(elem) / batch_multiplier


if __name__ == "__main__":
    # N=20 tokens (not a multiple of the token tile -> exercises the clipped
    # remainder block), vocab size 512; small tiles force a real multi-tile
    # accumulation path: grid = (3, 4).
    N, SIZE = 20, 512
    PADDING_IDX = 0
    SMOOTHING = 0.1
    BATCH_MULTIPLIER = 2.0

    key = jax.random.PRNGKey(0)
    k_logits, k_tgt = jax.random.split(key)

    logits = jax.random.normal(k_logits, (N, SIZE), dtype=jnp.float32)
    x = jax.nn.log_softmax(logits, axis=-1)          # KLDivLoss expects log-probs
    target = jax.random.randint(k_tgt, (N,), 0, SIZE, dtype=jnp.int32)
    target = target.at[3].set(PADDING_IDX)           # exercise padding-row masking

    loss = label_smoothing_kl_loss(
        x, target, size=SIZE, padding_idx=PADDING_IDX,
        smoothing=SMOOTHING, batch_multiplier=BATCH_MULTIPLIER,
        tile_n=8, tile_v=128)                        # grid = (3, 4)
    loss = jax.block_until_ready(loss)

    ref = _reference(x, target, size=SIZE, padding_idx=PADDING_IDX,
                     smoothing=SMOOTHING, batch_multiplier=BATCH_MULTIPLIER)
    assert jnp.allclose(loss, ref, rtol=1e-5, atol=1e-4), (loss, ref)

    print("KERNEL_OK")
</pallas_src>

<mosaic_0001>
module attributes {stable_mosaic.version = 11 : i64} {
  func.func @_row_sum_kernel(%arg0: i32, %arg1: i32, %arg2: memref<8x128xf32, #tpu.memory_space<vmem>>, %arg3: memref<8x128xf32, #tpu.memory_space<vmem>>) attributes {dimension_semantics = [#tpu.dimension_semantics<parallel>, #tpu.dimension_semantics<arbitrary>], iteration_bounds = array<i64: 3, 4>, scalar_prefetch = 0 : i64, scratch_operands = 0 : i64, tpu.core_type = #tpu.core_type<tc>, window_params = [{transform_indices = @transform_0, window_bounds = array<i64: 8, 128>}, {transform_indices = @transform_1, window_bounds = array<i64: 8, 128>}]} {
    %c0_i32 = arith.constant 0 : i32
    %0 = arith.cmpi eq, %arg1, %c0_i32 : i32
    %1 = arith.extui %0 : i1 to i32
    %c0_i32_0 = arith.constant 0 : i32
    %2 = arith.cmpi ne, %1, %c0_i32_0 : i32
    scf.if %2 {
      %cst = arith.constant 0.000000e+00 : f32
      %7 = vector.broadcast %cst : f32 to vector<8x128xf32>
      %c0_6 = arith.constant 0 : index
      %c0_7 = arith.constant 0 : index
      %8 = vector.load %arg3[%c0_6, %c0_7] : memref<8x128xf32, #tpu.memory_space<vmem>>, vector<8x128xf32>
      tpu.vector_store %arg3[%c0_6, %c0_7], %7 {strides = array<i32>} : memref<8x128xf32, #tpu.memory_space<vmem>>, vector<8x128xf32>,
    } else {
    }
    %c0 = arith.constant 0 : index
    %c0_1 = arith.constant 0 : index
    %3 = vector.load %arg3[%c0, %c0_1] : memref<8x128xf32, #tpu.memory_space<vmem>>, vector<8x128xf32>
    %c0_2 = arith.constant 0 : index
    %c0_3 = arith.constant 0 : index
    %4 = vector.load %arg2[%c0_2, %c0_3] : memref<8x128xf32, #tpu.memory_space<vmem>>, vector<8x128xf32>
    %5 = arith.addf %3, %4 : vector<8x128xf32>
    %c0_4 = arith.constant 0 : index
    %c0_5 = arith.constant 0 : index
    %6 = vector.load %arg3[%c0_4, %c0_5] : memref<8x128xf32, #tpu.memory_space<vmem>>, vector<8x128xf32>
    tpu.vector_store %arg3[%c0_4, %c0_5], %5 {strides = array<i32>} : memref<8x128xf32, #tpu.memory_space<vmem>>, vector<8x128xf32>,
    return
  }
  func.func @transform_0(%arg0: i32, %arg1: i32) -> (i32, i32) {
    %c0_i32 = arith.constant 0 : i32
    return %arg0, %arg1 : i32, i32
  }
  func.func @transform_1(%arg0: i32, %arg1: i32) -> (i32, i32) {
    %c0_i32 = arith.constant 0 : i32
    %c0_i32_0 = arith.constant 0 : i32
    return %arg0, %c0_i32 : i32, i32
  }
}

</mosaic_0001>

<bundles_post_ra>
// kernel: tpu_custom_call.1
= control target key start
LH: loop header
LB: loop body
LE: loop exit
PB: predicated region body
PF: predicated region fallthrough
CT: control target
= control target key end

     0   :  { %6 = vsyncpa [#allocation3], 0  ;;  %s708_s0 = inlined_call_operand.hbm [shape: f32[20,512], index: 0, kind: input, shape index: {}]   ;;  %s709_s1 = inlined_call_operand.hbm [shape: f32[20,128], index: 1, kind: output, shape index: {}]  }
   0x1   :  { %8 = vsyncpa [#allocation3 + $0x1], 0 }
   0x2   :  { %9 = vsyncpa [#allocation4], 0 }
   0x3   :  { %11 = vsyncpa [#allocation4 + $0x1], 0  ;;  %s541_s6 = smov 0   ;;  %s543_s7 = smov 0  }
   0x4   :  { %s545_s8 = smov 0   ;;  %s547_s9 = smov 0  }
   0x5   :  { %s549_s10 = smov 0   ;;  %s551_s11 = smov 0  }
   0x6   :  { %s553_s12 = smov 0   ;;  %s555_s13 = smov 0  }
   0x7   :  { %s557_s14 = smov 0   ;;  %s559_s15 = smov 0  }
   0x8   :  { %s561_s16 = smov 0  }
   0x9 LB: > { %s258_s17 = sadd.s32 4294967295, %s528_s16   ;;  %s259_s18 = sadd.s32 4294967294, %s528_s16   ;;  %s528_s16 = sphi %s561_s16, %s17_s16   ;;  %s524_s15 = sphi %s559_s15, %s726_s15   ;;  %s520_s14 = sphi %s557_s14, %s725_s14   ;;  %s516_s13 = sphi %s555_s13, %s724_s13   ;;  %s512_s12 = sphi %s553_s12, %s723_s12   ;;  %s508_s11 = sphi %s551_s11, %s722_s11   ;;  %s504_s10 = sphi %s549_s10, %s721_s10   ;;  %s500_s9 = sphi %s547_s9, %s720_s9   ;;  %s496_s8 = sphi %s545_s8, %s719_s8   ;;  %s492_s7 = sphi %s543_s7, %s718_s7   ;;  %s488_s6 = sphi %s541_s6, %s717_s6  }
   0xa   : > { %s26_s19 = sadd.s32 1, %s520_s14  ;;  %s29_s20 = sadd.s32 1, %s524_s15 }
   0xb   : > { %p27_p0 = scmp.ge.s32.totalorder %s26_s19, 4  ;;  %s38_s21 = sadd.s32 1, %s508_s11 }
   0xc   : > { %p45_p1 = scmp.ne.s32.totalorder %s508_s11, %s504_s10  ;;  %p46_p2 = scmp.eq.s32.totalorder %s528_s16, 0 }
   0xd   : > { %s728_s19 = smov (%p27_p0, %s26_s19), 0  ;;  %s730_s20 = smov (!%p27_p0, %s29_s20), %s524_s15 }
   0xe   : > { %s34_s22 = ssub.s32 %s520_s14, %s728_s19  ;;  %p607_p3 = por %p46_p2, %p45_p1 }
   0xf   : > { %p31_p4 = scmp.ge.s32.totalorder %s730_s20, 3  ;;  %p51_p5 = scmp.ne.s32.totalorder %s504_s10, %s500_s9 }
  0x10   : > { %p52_p6 = scmp.eq.s32.totalorder %s258_s17, 0  ;;  %s64_s24 = sadd.s32 1, %s496_s8 }
  0x11   : > { %s732_s20 = smov (%p31_p4, %s730_s20), 0  ;;  %p74_p8 = scmp.ne.s32.totalorder %s496_s8, %s492_s7 }
  0x12   : > { %712 = sst [smem:[#allocation8_spill]] %s732_s20  ;;  %p615_p7 = por %p52_p6, %p51_p5 }
  0x13   : > { %s33_s26 = ssub.s32 %s524_s15, %s732_s20  ;;  %p75_p9 = scmp.eq.s32.totalorder %s258_s17, 11 }
  0x14   : > { %s35_s27 = sor.u32 %s34_s22, %s33_s26  ;;  %p62_p10 = scmp.eq.s32.totalorder %s33_s26, 0 }
  0x15   : > { %p36_p11 = scmp.eq.s32.totalorder %s35_s27, 0  ;;  %p623_p12 = por %p75_p9, %p74_p8 }
  0x16   : > { %s628_s29 = scalar_select %p62_p10, %s496_s8, %s64_s24  }
  0x17   : > { %s631_s30 = scalar_select %p36_p11, %s508_s11, %s38_s21  }
  0x18   : > { %p80_p13 = scmp.ne.s32.totalorder %s492_s7, %s488_s6  ;;  %p81_p0 = scmp.eq.s32.totalorder %s259_s18, 11 }
  0x19   : > { %p285_p1 = scmp.lt.s32.totalorder %s528_s16, 12  ;;  %s101_s3 = sand.u32 1, %s508_s11  }
  0x1a   : > { %p636_p2 = por %p81_p0, %p80_p13  ;;  %s262_s4 = sshll.u32 %s101_s3, 3 }
  0x1b   : > { %s263_s5 = sshll.u32 %s524_s15, 2  ;;  %s105_s17 = scalar_lea.vmem [#allocation2], %s262_s4 }
  0x1c   : > { %s109_s9 = sadd.s32 %s520_s14, %s263_s5  ;;  %s115_s22 = sshll.u32 %s105_s17, 4  ;;  %s116_s22 = int_to_ptr.vmem [resolvable:$true] %s115_s22 }
  0x1d   : > { %s264_s26 = sshll.u32 %s109_s9, 3  ;;  %p278_p4 = pnand %p285_p1, %p607_p3 }
  0x1e   : > { %s111_s27 = scalar_lea.hbm %s708_s0, %s264_s26  ;;  %p265_p5 = scmp.ge.s32.totalorder %s528_s16, 1 }
  0x1f   : > { %s113_s18 = sshll.u32 %s111_s27, 4  ;;  %s102_s20 = scalar_lea.sflag [#allocation3], %s101_s3  ;;  %s114_s18 = int_to_ptr.hbm [resolvable:$true] %s113_s18 }
  0x20   : > { %280 = dma.hbm_to_vmem [thread:$0]  (!%p278_p4), %s114_s18, 128, %s116_s22, %s102_s20  }
  0x21   : > { %p120_p6 = scmp.lt.s32.totalorder %s528_s16, 13 }
  0x23   : > { %p121_p8 = pnand %p265_p5, %p120_p6 }
  0x24   : > { %s126_s4 = sand.u32 (!%p121_p8), 1, %s504_s10  }
  0x25   : > { %124 = sbr.rel (%p121_p8) target bundleno = 67 (0x43), region = 24  ;;  %s266_s5 = sshll.u32 (!%p121_p8), %s126_s4, 3 }
  0x26   : > { %s127_s9 = scalar_lea.sflag (!%p121_p8), [#allocation3], %s126_s4  ;;  %s130_s17 = scalar_lea.vmem (!%p121_p8), [#allocation2], %s266_s5 }
  0x2a   : > { %479 = dma.done.wait (%p615_p7), %s127_s9, 128  }
  0x2b   : > { %481 = vsyncadd (%p615_p7), %s127_s9, 4294967168  ;;  %s147_s23 = sand.u32 1, %s492_s7   ;;  %p268_p3 = scmp.ne.s32.totalorder %s512_s12, 0 }
  0x2c   : > { %s267_s26 = sshll.u32 %s147_s23, 3 }
  0x2d   : > { %s149_s24 = scalar_lea.vmem [#allocation5], %s267_s26  ;;  %153 = sbr.rel (%p268_p3) target bundleno = 52 (0x34), region = 32 }
  0x32   : > { %v530_v0 = vmov 0.0  }
  0x33   : > { %154 = vst [vmem:[%s149_s24] sm:$0xff] %v530_v0 }
  0x34 PF: > { %v156_v2 = vld [vmem:[%s130_s17] sm:$0xff]  ;;  %s270_s20 = sshll.u32 %s516_s13, 3  ;;  %s172_s21 = sshll.u32 %s149_s24, 4  ;;  %s173_s21 = int_to_ptr.vmem [resolvable:$true] %s172_s21 }
  0x35   : > { %s170_s25 = scalar_lea.hbm %s709_s1, %s270_s20  ;;  %s160_s12 = scalar_lea.sflag [#allocation4], %s147_s23 }
  0x36   : > { %s174_s27 = sshll.u32 %s170_s25, 4  ;;  %s426_s9 = scalar_lea.hbm %s709_s1, 24  ;;  %s175_s27 = int_to_ptr.hbm [resolvable:$true] %s174_s27 }
  0x37   : > { %s420_s18 = sshra.s32 %s175_s27, 4  ;;  %s421_s18 = int_to_ptr.hbm [resolvable:$true] %s420_s18 }
  0x38   : > { %s422_s4 = scalar_lea.hbm %s421_s18, 8  ;;  %p427_p11 = scmp.lt.s32.totalorder %s421_s18, %s709_s1 }
  0x39   : > { %p423_p7 = scmp.ne.s32.totalorder %s421_s18, %s422_s4  ;;  %p428_p13 = scmp.lt.s32.totalorder %s426_s9, %s422_s4 }
  0x3a   : > { %v155_v1 = vld [vmem:[%s149_s24] sm:$0xff] }
  0x3b   : > { %v157_v3 = vadd.f32 %v156_v2, %v155_v1  ;;  %p424_p9 = pnand %p423_p7, %p623_p12  ;;  %p429_p0 = por %p428_p13, %p427_p11 }
  0x3d   : > { %158 = vst [vmem:[%s149_s24] sm:$0xff] %v157_v3  ;;  %p425_p10 = pneg %p424_p9 }
  0x3f   : > { %p430_p1 = pnand %p429_p0, %p425_p10 }
  0x41   : > { %433 = shalt.err (!%p430_p1)
}
  0x42   : > { %275 = dma.vmem_to_hbm [thread:$0]  (%p623_p12), %s173_s21, 128, %s175_s27, %s160_s12  }
  0x43 PF: > { %p286_p4 = scmp.ge.s32.totalorder %s528_s16, 2  ;;  %s186_s23 = sand.u32 1, %s488_s6  }
  0x44   : > { %s187_s24 = scalar_lea.sflag [#allocation4], %s186_s23 }
  0x45   : > { %p282_p5 = pnand %p286_p4, %p636_p2 }
  0x47   : > { %p283_p6 = pneg %p282_p5 }
  0x49   : > { %483 = dma.done.wait (%p283_p6), %s187_s24, 128  }
  0x4a   : > { %485 = vsyncadd (%p283_p6), %s187_s24, 4294967168  ;;  %s17_s16 = sadd.s32 1, %s528_s16   ;;  %s716_s28 = sld [smem:[#allocation8_spill]] }
  0x4b   : > { %p14_p8 = scmp.ge.s32.totalorder %s17_s16, 14   ;;  %s717_s6 = smov %s492_s7 }
  0x4c   : > { %s718_s7 = smov %s496_s8  ;;  %s719_s8 = smov %s628_s29 }
  0x4d   : > { %s720_s9 = smov %s504_s10  ;;  %s721_s10 = smov %s508_s11 }
  0x4e   : > { %s722_s11 = smov %s631_s30  ;;  %s723_s12 = smov %s520_s14 }
  0x4f   : > { %s724_s13 = smov %s524_s15  ;;  %s725_s14 = smov %s728_s19 }
  0x50   : > { %s726_s15 = smov %s716_s28  ;;  %16 = sbr.rel (!%p14_p8) target bundleno = 9 (0x9), region = 73 }
  0x55   :  { %193 = vsyncpa [#allocation3], 1 }
  0x56   :  { %195 = vsyncpa [#allocation3 + $0x1], 1 }
  0x57   :  { %196 = vsyncpa [#allocation4], 1 }
  0x58   :  { %198 = vsyncpa [#allocation4 + $0x1], 1 }

</bundles_post_ra>
